<compile_context>
chip_gen: v6e
topology: v6e:2x2x1
jax: 0.10.0
libtpu: 0.0.40
codegen_flags: <defaults>
</compile_context>

<pallas_src>
import functools

import jax
import jax.numpy as jnp
from jax.experimental import pallas as pl
from jax.experimental.pallas import tpu as pltpu


def _upscale2d_kernel(x_ref, up_w_ref, o_ref, *, factor, gain):
    # x_ref:    (TR, W)          rows of the flattened (N*C*H, W) input.
    # up_w_ref: (W, W*factor)    exact 0/1 lane-replication matrix.
    # o_ref:    (TR, f*f*W)      each kernel row holds the `factor` replicated upsampled image
    #                            rows concatenated along the lane axis (lane-dense stores); the
    #                            wrapper reshape back to (N, C, H*f, W*f) is a free view.
    x = x_ref[...]
    if gain != 1:
        x = x * jnp.asarray(gain, dtype=x.dtype)          # matches reference dtype/rounding
    y = jnp.dot(x, up_w_ref[...], preferred_element_type=jnp.float32)
    y = y.astype(o_ref.dtype)                             # exact: 0/1-selected copies
    o_ref[...] = jnp.concatenate([y] * factor, axis=-1)   # sublane (row) replication, laid out on lanes


def upscale2d_pallas(x, factor=2, gain=1, *, block_rows=512):
    assert x.ndim == 4
    assert isinstance(factor, int) and factor >= 1
    N, C, H, W = x.shape

    # factor == 1: pure (optional) scale, no kernel needed.
    if factor == 1:
        return x * jnp.asarray(gain, x.dtype) if gain != 1 else x

    Ho, Wo = H * factor, W * factor
    rows = N * C * H
    out_cols = factor * Wo          # = f*f*W

    # Free (metadata-only) flatten: every image row is an independent work row.
    x2 = x.reshape(rows, W)

    # Exact 0/1 lane-replication matrix in the input dtype: up_w[w, wo] = 1 iff wo // factor == w.
    wo_idx = jax.lax.broadcasted_iota(jnp.int32, (W, Wo), 1)
    w_idx = jax.lax.broadcasted_iota(jnp.int32, (W, Wo), 0)
    up_w = (wo_idx // factor == w_idx).astype(x.dtype)

    # Row tile: as many rows per grid step as comfortably fits (amortizes per-step overhead).
    if rows <= block_rows:
        tr = rows                       # single full block (always a legal block shape)
    else:
        tr = max(32, (block_rows // 32) * 32)   # multiple of 32: legal sublane tile for f32/bf16/int8
    grid = (pl.cdiv(rows, tr),)

    itemsize = jnp.dtype(x.dtype).itemsize
    # VMEM budget: double-buffered in/out tiles + replication matrix + f32 matmul temp, with headroom.
    block_bytes = (tr * W + tr * out_cols + W * Wo) * itemsize + tr * Wo * 4
    vmem_limit = int(min(max(4 * block_bytes, 32 * 1024 * 1024), 64 * 1024 * 1024))

    bytes_accessed = (rows * W + rows * out_cols + W * Wo) * itemsize
    cost = pl.CostEstimate(flops=2 * rows * W * Wo,
                           transcendentals=0,
                           bytes_accessed=bytes_accessed)

    kernel = functools.partial(_upscale2d_kernel, factor=factor, gain=gain)
    out2 = pl.pallas_call(
        kernel,
        out_shape=jax.ShapeDtypeStruct((rows, out_cols), x.dtype),
        grid_spec=pltpu.PrefetchScalarGridSpec(
            num_scalar_prefetch=0,
            grid=grid,
            in_specs=[
                pl.BlockSpec((tr, W), lambda i: (i, 0)),
                pl.BlockSpec((W, Wo), lambda i: (0, 0)),   # constant block: fetched once
            ],
            out_specs=pl.BlockSpec((tr, out_cols), lambda i: (i, 0)),
        ),
        compiler_params=pltpu.CompilerParams(
            dimension_semantics=("parallel",),
            vmem_limit_bytes=vmem_limit,
        ),
        cost_estimate=cost,
    )(x2, up_w)

    # Free (metadata-only) reshape: (N*C*H, f*f*W) row-major IS (N, C, H*f, W*f) row-major.
    return out2.reshape(N, C, Ho, Wo)


def upscale2d_ref(x, factor=2, gain=1):
    # Pure-JAX reference mirroring the PyTorch semantics exactly.
    if gain != 1:
        x = x * jnp.asarray(gain, x.dtype)
    if factor != 1:
        N, C, H, W = x.shape
        x = jnp.broadcast_to(x[:, :, :, None, :, None],
                             (N, C, H, factor, W, factor))
        x = x.reshape(N, C, H * factor, W * factor)
    return x


if __name__ == "__main__":
    key = jax.random.PRNGKey(0)
    x = jax.random.normal(key, (2, 4, 16, 16), dtype=jnp.float32)

    # Default Upscale2d config used inside GSynthesisBlock (factor=2, gain=1); 2-step grid.
    out = upscale2d_pallas(x, factor=2, gain=1, block_rows=64)
    out = jax.block_until_ready(out)
    ref = upscale2d_ref(x, factor=2, gain=1)
    assert out.shape == (2, 4, 32, 32), out.shape
    assert out.dtype == x.dtype, out.dtype
    assert jnp.array_equal(out, ref), "mismatch vs reference (factor=2, gain=1)"

    # factor=4 with a gain, single-step grid.
    out4 = jax.block_until_ready(upscale2d_pallas(x, factor=4, gain=2))
    assert jnp.array_equal(out4, upscale2d_ref(x, factor=4, gain=2)), "mismatch (factor=4, gain=2)"

    # bf16 path: native-dtype operands, f32 accumulation, exact for 0/1 weights.
    xb = x.astype(jnp.bfloat16)
    outb = jax.block_until_ready(upscale2d_pallas(xb, factor=2, gain=1))
    assert outb.dtype == jnp.bfloat16
    assert jnp.array_equal(outb, upscale2d_ref(xb, factor=2, gain=1)), "mismatch (bf16)"

    # factor == 1 early-return path.
    out1 = jax.block_until_ready(upscale2d_pallas(x, factor=1, gain=1))
    assert jnp.array_equal(out1, x), "mismatch (factor=1)"

    print("KERNEL_OK")
</pallas_src>

<mosaic_0001>
module attributes {stable_mosaic.version = 11 : i64} {
  func.func @_upscale2d_kernel(%arg0: i32, %arg1: memref<64x16xf32, #tpu.memory_space<vmem>>, %arg2: memref<16x32xf32, #tpu.memory_space<vmem>>, %arg3: memref<64x64xf32, #tpu.memory_space<vmem>>) attributes {dimension_semantics = [#tpu.dimension_semantics<parallel>], iteration_bounds = array<i64: 2>, scalar_prefetch = 0 : i64, scratch_operands = 0 : i64, tpu.core_type = #tpu.core_type<tc>, window_params = [{transform_indices = @transform_0, window_bounds = array<i64: 64, 16>}, {pipeline_mode = #tpu.pipeline_mode<synchronous>, transform_indices = @transform_1, window_bounds = array<i64: 16, 32>}, {transform_indices = @transform_2, window_bounds = array<i64: 64, 64>}]} {
    %c0 = arith.constant 0 : index
    %c0_0 = arith.constant 0 : index
    %0 = vector.load %arg1[%c0, %c0_0] : memref<64x16xf32, #tpu.memory_space<vmem>>, vector<64x16xf32>
    %c0_1 = arith.constant 0 : index
    %c0_2 = arith.constant 0 : index
    %1 = vector.load %arg2[%c0_1, %c0_2] : memref<16x32xf32, #tpu.memory_space<vmem>>, vector<16x32xf32>
    %cst = arith.constant dense<0.000000e+00> : vector<64x32xf32>
    %2 = tpu.matmul %0, %1, %cst {dimension_numbers = #tpu.dot_dimension_numbers<[1], [0], [0], [1], [0, 0, 1, 1], [], []>} : vector<64x16xf32>, vector<16x32xf32>, vector<64x32xf32> -> vector<64x32xf32>
    %3 = tpu.concatenate %2, %2 in 1 : vector<64x32xf32>, vector<64x32xf32> -> vector<64x64xf32>
    %c0_3 = arith.constant 0 : index
    %c0_4 = arith.constant 0 : index
    %4 = vector.load %arg3[%c0_3, %c0_4] : memref<64x64xf32, #tpu.memory_space<vmem>>, vector<64x64xf32>
    tpu.vector_store %arg3[%c0_3, %c0_4], %3 {strides = array<i32>} : memref<64x64xf32, #tpu.memory_space<vmem>>, vector<64x64xf32>,
    return
  }
  func.func @transform_0(%arg0: i32) -> (i32, i32) {
    %c0_i32 = arith.constant 0 : i32
    %c0_i32_0 = arith.constant 0 : i32
    return %arg0, %c0_i32 : i32, i32
  }
  func.func @transform_1(%arg0: i32) -> (i32, i32) {
    %c0_i32 = arith.constant 0 : i32
    %c0_i32_0 = arith.constant 0 : i32
    %c0_i32_1 = arith.constant 0 : i32
    return %c0_i32, %c0_i32_0 : i32, i32
  }
  func.func @transform_2(%arg0: i32) -> (i32, i32) {
    %c0_i32 = arith.constant 0 : i32
    %c0_i32_0 = arith.constant 0 : i32
    return %arg0, %c0_i32 : i32, i32
  }
}

</mosaic_0001>

<bundles_post_ra>
// kernel: tpu_custom_call.1
= control target key start
LH: loop header
LB: loop body
LE: loop exit
PB: predicated region body
PF: predicated region fallthrough
CT: control target
= control target key end

     0   :  { %s475_s9 = smov 0   ;;  %s529_s0 = inlined_call_operand.vmem [shape: f32[128,16], index: 0, kind: input, shape index: {}]   ;;  %s530_s1 = inlined_call_operand.vmem [shape: f32[16,32], index: 1, kind: input, shape index: {}]   ;;  %s531_s2 = inlined_call_operand.vmem [shape: f32[128,64], index: 2, kind: output, shape index: {}]  }
   0x1 LB: > { %s393_s10 = sadd.s32 4294967295, %s457_s9   ;;  %p397_p0 = scmp.ge.s32.totalorder %s457_s9, 1  ;;  %s457_s9 = sphi %s475_s9, %s12_s9  }
   0x2   : > { %p113_p1 = scmp.lt.s32.totalorder %s457_s9, 3 }
   0x4   : > { %p114_p2 = pnand %p397_p0, %p113_p1 }
   0x5   : > { %s398_s15 = sshll.u32 (!%p114_p2), %s393_s10, 3  ;;  %s459_s20 = smov (!%p114_p2), 32  }
   0x6   : > { %117 = sbr.rel (%p114_p2) target bundleno = 339 (0x153), region = 28  ;;  %p136_p3 = scmp.lt.s32.totalorder (!%p114_p2), %s398_s15, 15 }
   0xb   : > { %v156_v0 = vld [vmem:[%s530_s1 + $0x8] sm:$0xff]  ;;  %v155_v1 = vld [vmem:[%s530_s1] sm:$0xff]  ;;  %s533_s15 = smov (!%p136_p3, %s398_s15), 15  ;;  %vm157_vm0 = vcmask 130048   ;;  %vm319_vm1 = vcmask 261120   ;;  %vm328_vm2 = vcmask 523264  }
   0xc   : > { %422 = vmatprep.subr.mxu0 %v156_v0  ;;  %438 = vmatprep.subr.mxu1 %v156_v0  ;;  %s399_s16 = sshll.u32 %s533_s15, 3 }
   0xd   : > { %423 = vmatpush3.msra.mxu0 %v156_v0  ;;  %440 = vmatpush3.msra.mxu1 %v156_v0  ;;  %s139_s19 = scalar_lea.vmem %s529_s0, %s399_s16  ;;  %s145_s23 = scalar_lea.vmem %s531_s2, %s399_s16 }
   0xe   : > { %424 = vmatprep.subr.mxu0 %v155_v1  ;;  %439 = vmatprep.subr.mxu1 %v155_v1  ;;  %v147_v2 = vld [vmem:[%s139_s19] sm:$0xff]  ;;  %v148_v4 = vld [vmem:[%s139_s19 + $0x8] sm:$0xff]  ;;  %v149_v6 = vld [vmem:[%s139_s19 + $0x10] sm:$0xff] }
   0xf   : > { %425 = vmatpush3.msra.mxu0 %v155_v1  ;;  %441 = vmatpush3.msra.mxu1 %v155_v1  ;;  %v151_v3 = vld [vmem:[%s139_s19 + $0x20] sm:$0xff]  ;;  %v152_v5 = vld [vmem:[%s139_s19 + $0x28] sm:$0xff]  ;;  %v153_v7 = vld [vmem:[%s139_s19 + $0x30] sm:$0xff] }
  0x10   : > { %426 = vmatprep.mubr.msk.f32.mxu0 %vm157_vm0, %v147_v2  ;;  %432 = vmatprep.mubr.msk.f32.mxu1 %vm157_vm0, %v151_v3  ;;  %v150_v8 = vld [vmem:[%s139_s19 + $0x18] sm:$0xff] }
  0x11   : > { %427 = vmatmul.mubr.msk.f32.vlgmr.msra.gmra.mxu0 %vm157_vm0, %v148_v4  ;;  %433 = vmatmul.mubr.msk.f32.vlgmr.msra.gmra.mxu1 %vm157_vm0, %v152_v5  ;;  %v154_v9 = vld [vmem:[%s139_s19 + $0x38] sm:$0xff] }
  0x12   : > { %429 = vmatprep.mubr.msk.f32.mxu0 %vm157_vm0, %v149_v6  ;;  %435 = vmatprep.mubr.msk.f32.mxu1 %vm157_vm0, %v153_v7 }
  0x15   : > { %430 = vmatmul.mubr.msk.f32.gmra.mxu0 %vm157_vm0, %v150_v8  ;;  %436 = vmatmul.mubr.msk.f32.gmra.mxu1 %vm157_vm0, %v154_v9 }
  0xd1   : > { %v428_v10 = vpop.f32.mrf.mxu0  ;;  %v434_v11 = vpop.f32.mrf.mxu1 }
  0xd2   : > { %305 = vrot.lane.b32.xlu1 %v434_v11, %s459_s20  ;;  %297 = vrot.lane.b32.xlu0 %v428_v10, %s459_s20 }
  0xd3   : > { %v248_v12 = vpop.f32.mrf.mxu0  ;;  %v268_v14 = vpop.f32.mrf.mxu1 }
  0xd5   : > { %v431_v13 = vpop.f32.mrf.mxu0  ;;  %v437_v16 = vpop.f32.mrf.mxu1 }
  0xd6   : > { %295 = vrot.lane.b32.xlu0 %v248_v12, %s459_s20  ;;  %301 = vrot.lane.b32.xlu1 %v431_v13, %s459_s20 }
  0xd7   : > { %v258_v15 = vpop.f32.mrf.mxu0  ;;  %v278_v17 = vpop.f32.mrf.mxu1 }
  0xda   : > { %303 = vrot.lane.b32.xlu0 %v268_v14, %s459_s20  ;;  %299 = vrot.lane.b32.xlu1 %v258_v15, %s459_s20 }
  0xde   : > { %307 = vrot.lane.b32.xlu0 %v278_v17, %s459_s20  ;;  %309 = vrot.lane.b32.xlu1 %v437_v16, %s459_s20 }
 0x144   : > { %v306_v18 = vpop.permute.xlu1 %305  ;;  %v298_v19 = vpop.permute.xlu0 %297 }
 0x145   : > { %v325_v20 = vsel %vm319_vm1, %v434_v11, %v306_v18  ;;  %v321_v21 = vsel %vm319_vm1, %v428_v10, %v298_v19 }
 0x146   : > { %334 = vst.msk [vmem:[%s145_s23 + $0x28] sm:$0xff] %vm328_vm2, %v325_v20  ;;  %330 = vst.msk [vmem:[%s145_s23 + $0x8] sm:$0xff] %vm328_vm2, %v321_v21 }
 0x148   : > { %v296_v22 = vpop.permute.xlu0 %295  ;;  %v302_v23 = vpop.permute.xlu1 %301 }
 0x149   : > { %v320_v24 = vsel %vm319_vm1, %v248_v12, %v296_v22  ;;  %v323_v25 = vsel %vm319_vm1, %v431_v13, %v302_v23 }
 0x14a   : > { %329 = vst.msk [vmem:[%s145_s23] sm:$0xff] %vm328_vm2, %v320_v24  ;;  %332 = vst.msk [vmem:[%s145_s23 + $0x18] sm:$0xff] %vm328_vm2, %v323_v25 }
 0x14c   : > { %v304_v26 = vpop.permute.xlu0 %303  ;;  %v300_v27 = vpop.permute.xlu1 %299 }
 0x14d   : > { %v324_v28 = vsel %vm319_vm1, %v268_v14, %v304_v26  ;;  %v322_v29 = vsel %vm319_vm1, %v258_v15, %v300_v27 }
 0x14e   : > { %333 = vst.msk [vmem:[%s145_s23 + $0x20] sm:$0xff] %vm328_vm2, %v324_v28  ;;  %331 = vst.msk [vmem:[%s145_s23 + $0x10] sm:$0xff] %vm328_vm2, %v322_v29 }
 0x150   : > { %v308_v30 = vpop.permute.xlu0 %307  ;;  %v310_v31 = vpop.permute.xlu1 %309 }
 0x151   : > { %v326_v32 = vsel %vm319_vm1, %v278_v17, %v308_v30  ;;  %v327_v33 = vsel %vm319_vm1, %v437_v16, %v310_v31 }
 0x152   : > { %335 = vst.msk [vmem:[%s145_s23 + $0x30] sm:$0xff] %vm328_vm2, %v326_v32  ;;  %336 = vst.msk [vmem:[%s145_s23 + $0x38] sm:$0xff] %vm328_vm2, %v327_v33 }
 0x153 PF: > { %s12_s9 = sadd.s32 1, %s457_s9  }
 0x154   : > { %p9_p4 = scmp.ge.s32.totalorder %s12_s9, 4  }
 0x156   :  { %11 = sbr.rel (!%p9_p4) target bundleno = 1 (0x1), region = 58 }

</bundles_post_ra>
